<compile_context>
chip_gen: v6e
topology: v6e:2x2x1
jax: 0.10.0
libtpu: 0.0.40
codegen_flags: <defaults>
</compile_context>

<pallas_src>
import jax
import jax.numpy as jnp
from jax.experimental import pallas as pl
from jax.experimental.pallas import tpu as pltpu


def _identity_alias_kernel(x_ref, o_ref, flag_ref):
    # x_ref and o_ref alias the SAME HBM buffer (input_output_aliases={0: 0}),
    # so the identity requires no data movement.  One scalar SMEM store keeps
    # the kernel body non-empty; it touches no HBM and costs ~1 bundle.
    del x_ref, o_ref
    flag_ref[0] = jnp.int32(1)


def dummy_transformer_block(x):
    """Identity forward pass: output aliases the input buffer — no HBM traffic."""
    return pl.pallas_call(
        _identity_alias_kernel,
        out_shape=jax.ShapeDtypeStruct(x.shape, x.dtype),
        # Raw in-place HBM refs: no block tiling, no automatic HBM<->VMEM DMA.
        in_specs=[pl.BlockSpec(memory_space=pl.ANY)],
        out_specs=pl.BlockSpec(memory_space=pl.ANY),
        scratch_shapes=[pltpu.SMEM((1,), jnp.int32)],
        # Output 0 reuses input 0's buffer -> the "copy" is free.
        input_output_aliases={0: 0},
    )(x)


if __name__ == "__main__":
    key = jax.random.PRNGKey(0)
    # batch=2, seq=8, hidden=32 — small shapes consistent with a GPT-style block.
    x = jax.random.normal(key, (2, 8, 32), dtype=jnp.float32)

    y = dummy_transformer_block(x)
    jax.block_until_ready(y)

    assert y.shape == x.shape and y.dtype == x.dtype
    assert bool(jnp.all(y == x))
    print("KERNEL_OK")
</pallas_src>

<mosaic_0001>
module attributes {stable_mosaic.version = 11 : i64} {
  func.func @_identity_alias_kernel(%arg0: memref<2x8x32xf32, #tpu.memory_space<any>>, %arg1: memref<2x8x32xf32, #tpu.memory_space<any>>, %arg2: memref<1xi32, #tpu.memory_space<smem>>) attributes {dimension_semantics = [], scalar_prefetch = 0 : i64, scratch_operands = 1 : i64, tpu.core_type = #tpu.core_type<tc>} {
    %c1_i32 = arith.constant 1 : i32
    %c0 = arith.constant 0 : index
    %0 = memref.load %arg2[%c0] : memref<1xi32, #tpu.memory_space<smem>>
    memref.store %c1_i32, %arg2[%c0] : memref<1xi32, #tpu.memory_space<smem>>
    return
  }
}

</mosaic_0001>

<bundles_post_ra>
// kernel: tpu_custom_call.1
= control target key start
LH: loop header
LB: loop body
LE: loop exit
PB: predicated region body
PF: predicated region fallthrough
CT: control target
= control target key end

     0   :  { %s18_s0 = inlined_call_operand.hbm [shape: f32[2,8,32], index: 0, kind: input, shape index: {}, may-alias: {0,1}]   ;;  %s19_s1 = inlined_call_operand.hbm [shape: f32[2,8,32], index: 1, kind: output, shape index: {}, may-alias: {0,1}]  }

</bundles_post_ra>
